<compile_context>
chip_gen: v6e
topology: v6e:2x2x1
jax: 0.10.0
libtpu: 0.0.40
codegen_flags: <defaults>
</compile_context>

<pallas_src>
import functools
import math

import jax
import jax.numpy as jnp
from jax.experimental import pallas as pl
from jax.experimental.pallas import tpu as pltpu

LN_EPS = 1e-12                  # HF ViT default layer_norm_eps


# ------------------------- generation-dependent config -----------------------

def _detect_vmem_capacity_bytes():
    try:
        info = pltpu.get_tpu_info()
        for attr in ("vmem_capacity_bytes", "vmem_size_bytes", "vmem_bytes"):
            v = getattr(info, attr, None)
            if v:
                return int(v)
    except Exception:
        pass
    return 64 * 1024 * 1024      # conservative default (v7x-sized part)


_VMEM_CAP = _detect_vmem_capacity_bytes()
if _VMEM_CAP >= 100 * 1024 * 1024:      # 128-MiB parts: v5e / v6e
    ROW_TILE = 512
    VMEM_LIMIT = 96 * 1024 * 1024
else:                                    # 64-MiB parts: v7x
    ROW_TILE = 256
    VMEM_LIMIT = 48 * 1024 * 1024


_BUFFERED_ONE_OK = None


def _buffered_one_supported():
    """One-time probe: is pipeline_mode=pl.Buffered(1) accepted by this JAX/Mosaic?
    Single-buffering resident operands is a pure VMEM saving on v7x; fall back cleanly."""
    global _BUFFERED_ONE_OK
    if _BUFFERED_ONE_OK is None:
        try:
            def _probe_kernel(x_ref, w_ref, o_ref):
                o_ref[...] = x_ref[...] + w_ref[...]

            f = pl.pallas_call(
                _probe_kernel,
                out_shape=jax.ShapeDtypeStruct((8, 128), jnp.float32),
                grid=(2,),
                in_specs=[pl.BlockSpec((8, 128), lambda i: (0, 0)),
                          pl.BlockSpec((8, 128), lambda i: (0, 0),
                                       pipeline_mode=pl.Buffered(1))],
                out_specs=pl.BlockSpec((8, 128), lambda i: (0, 0)),
            )
            jax.block_until_ready(f(jnp.zeros((8, 128), jnp.float32),
                                    jnp.ones((8, 128), jnp.float32)))
            _BUFFERED_ONE_OK = True
        except Exception:
            _BUFFERED_ONE_OK = False
    return _BUFFERED_ONE_OK


# --------------------------------- helpers -----------------------------------

def _row_tile(m):
    return m if m <= ROW_TILE else ROW_TILE


def _compiler_params(num_grid_axes=1):
    return pltpu.CompilerParams(
        dimension_semantics=("parallel",) * num_grid_axes,
        vmem_limit_bytes=VMEM_LIMIT)


def _resident(shape):
    """Constant-index block: DMA'd once, stays in VMEM across the row axis.
    Single-buffered (Buffered(1)) when supported -> half the weight VMEM on v7x."""
    n = len(shape)
    idx = lambda *_: (0,) * n
    if _buffered_one_supported():
        try:
            return pl.BlockSpec(shape, idx, pipeline_mode=pl.Buffered(1))
        except Exception:
            pass
    return pl.BlockSpec(shape, idx)


def _row_spec(tm, cols):
    return pl.BlockSpec((tm, cols), lambda i: (i, 0))


def _ln(x, g, b):
    mu = jnp.mean(x, axis=-1, keepdims=True)
    xc = x - mu
    var = jnp.mean(xc * xc, axis=-1, keepdims=True)
    return xc * jax.lax.rsqrt(var + LN_EPS) * g + b


def _head_group(num_heads, head_dim):
    # Smallest head group whose lane width (g*Dh) is a multiple of 128 -> lane-dense,
    # unmasked stores and a finer grid (2-TC sharding on v7x even at B=1).
    for g in range(1, num_heads + 1):
        if num_heads % g == 0 and (g * head_dim) % 128 == 0:
            return g
    return num_heads


# ----------------------------- Pallas kernels ---------------------------------

def _matmul_bias_kernel(x_ref, w_ref, b_ref, o_ref):
    acc = jnp.dot(x_ref[...].astype(jnp.bfloat16), w_ref[...],
                  preferred_element_type=jnp.float32)
    o_ref[...] = (acc + b_ref[...]).astype(o_ref.dtype)


def _ln_qkv_kernel(x_ref, g_ref, bt_ref, wq_ref, wk_ref, wv_ref,
                   bq_ref, bk_ref, bv_ref, o_ref):
    # LN1 + Q/K/V projections; writes a packed (3, tm, D) bf16 block so attention can
    # consume Q/K/V directly (no XLA head-split transpose / extra HBM round trip).
    h = _ln(x_ref[...].astype(jnp.float32), g_ref[...], bt_ref[...]).astype(jnp.bfloat16)
    for idx, (w_ref, b_ref) in enumerate(
            ((wq_ref, bq_ref), (wk_ref, bk_ref), (wv_ref, bv_ref))):
        acc = jnp.dot(h, w_ref[...], preferred_element_type=jnp.float32) + b_ref[...]
        o_ref[idx] = acc.astype(o_ref.dtype)


def _attention_kernel(qkv_ref, o_ref, *, heads, head_dim):
    # qkv_ref: (3, S, heads*head_dim) bf16 for one image / one head group.
    # 1/sqrt(head_dim) is already folded into the Q projection weights (init-time).
    S = qkv_ref.shape[1]

    def split(i):
        # (S, g*Dh) -> (g, S, Dh): one XLU transpose instead of per-head slices/concats.
        return jnp.transpose(qkv_ref[i].reshape(S, heads, head_dim), (1, 0, 2))

    q, k, v = split(0), split(1), split(2)
    s = jax.lax.dot_general(q, k, (((2,), (2,)), ((0,), (0,))),
                            preferred_element_type=jnp.float32)            # (g, S, S) f32
    m = jnp.max(s, axis=-1, keepdims=True)                                 # f32 statistics
    p = jnp.exp(s - m)
    denom = jnp.sum(p, axis=-1, keepdims=True)
    ctx = jax.lax.dot_general(p.astype(jnp.bfloat16), v,
                              (((2,), (1,)), ((0,), (0,))),
                              preferred_element_type=jnp.float32)          # (g, S, Dh) f32
    ctx = ctx * pl.reciprocal(denom, approx=True)   # EUP recip; scales (S,Dh), not (S,S)
    merged = jnp.transpose(ctx, (1, 0, 2)).reshape(S, heads * head_dim)    # (S, g*Dh)
    o_ref[...] = merged.astype(o_ref.dtype)                                # lane-dense store


def _oproj_ln_mlp_kernel(ctx_ref, res_ref, wo_ref, bo_ref, g_ref, bt_ref,
                         w1_ref, b1_ref, w2_ref, b2_ref, o_ref):
    # Fused: o-proj + residual -> LN2 -> W1 -> exact GELU -> W2 -> + residual.
    # Post-attention residual and the (tm, intermediate) activation never hit HBM.
    attn = jnp.dot(ctx_ref[...], wo_ref[...],
                   preferred_element_type=jnp.float32) + bo_ref[...]
    x = attn + res_ref[...]                                    # f32 residual stream
    h = _ln(x, g_ref[...], bt_ref[...])
    inter = jnp.dot(h.astype(jnp.bfloat16), w1_ref[...],
                    preferred_element_type=jnp.float32) + b1_ref[...]
    inter = jax.nn.gelu(inter, approximate=False)              # exact erf GELU ("gelu")
    acc = jnp.dot(inter.astype(jnp.bfloat16), w2_ref[...],
                  preferred_element_type=jnp.float32)
    o_ref[...] = (acc + b2_ref[...] + x).astype(o_ref.dtype)


# ---------------------------- pallas_call wrappers ----------------------------

def matmul_bias(x, w, b):
    M, K = x.shape
    N = w.shape[1]
    tm = _row_tile(M)
    cost = pl.CostEstimate(flops=2 * M * K * N, transcendentals=0,
                           bytes_accessed=M * K * 2 + K * N * 2 + N * 4 + M * N * 4)
    return pl.pallas_call(
        _matmul_bias_kernel,
        out_shape=jax.ShapeDtypeStruct((M, N), jnp.float32),
        grid=(pl.cdiv(M, tm),),
        in_specs=[_row_spec(tm, K), _resident(w.shape), _resident(b.shape)],
        out_specs=_row_spec(tm, N),
        compiler_params=_compiler_params(),
        cost_estimate=cost,
    )(x, w, b)


def ln_qkv(x, g, beta, wq, wk, wv, bq, bk, bv):
    M, D = x.shape
    tm = _row_tile(M)
    cost = pl.CostEstimate(flops=6 * M * D * D + 10 * M * D, transcendentals=M,
                           bytes_accessed=M * D * 4 + 3 * D * D * 2 + 3 * M * D * 2)
    return pl.pallas_call(
        _ln_qkv_kernel,
        out_shape=jax.ShapeDtypeStruct((3, M, D), jnp.bfloat16),
        grid=(pl.cdiv(M, tm),),
        in_specs=[_row_spec(tm, D), _resident(g.shape), _resident(beta.shape),
                  _resident(wq.shape), _resident(wk.shape), _resident(wv.shape),
                  _resident(bq.shape), _resident(bk.shape), _resident(bv.shape)],
        out_specs=pl.BlockSpec((3, tm, D), lambda i: (0, i, 0)),
        compiler_params=_compiler_params(),
        cost_estimate=cost,
    )(x, g, beta, wq, wk, wv, bq, bk, bv)


def attention(qkv, *, num_heads):
    # qkv: (3, B, S, D) bf16, packed straight from ln_qkv (free reshape, no XLA transpose).
    _, B, S, D = qkv.shape
    Dh = D // num_heads
    g = _head_group(num_heads, Dh)
    gD = g * Dh
    n_groups = num_heads // g
    kern = functools.partial(_attention_kernel, heads=g, head_dim=Dh)
    cost = pl.CostEstimate(flops=4 * B * num_heads * S * S * Dh,
                           transcendentals=B * num_heads * S * S,
                           bytes_accessed=3 * B * S * D * 2 + B * S * D * 2)
    return pl.pallas_call(
        kern,
        out_shape=jax.ShapeDtypeStruct((B, S, D), jnp.bfloat16),
        grid=(B, n_groups),
        in_specs=[pl.BlockSpec((3, None, S, gD), lambda b, h: (0, b, 0, h))],
        out_specs=pl.BlockSpec((None, S, gD), lambda b, h: (b, 0, h)),
        compiler_params=_compiler_params(2),
        cost_estimate=cost,
    )(qkv)


def oproj_ln_mlp(ctx, x, wo, bo, g, beta, w1, b1, w2, b2):
    M, D = ctx.shape
    I = w1.shape[1]
    tm = _row_tile(M)
    cost = pl.CostEstimate(
        flops=2 * M * D * D + 4 * M * D * I + 14 * M * D,
        transcendentals=M * I + M,
        bytes_accessed=M * D * 2 + 2 * M * D * 4 + (D * D + 2 * D * I) * 2
                       + (2 * D + I) * 4)
    return pl.pallas_call(
        _oproj_ln_mlp_kernel,
        out_shape=jax.ShapeDtypeStruct((M, D), jnp.float32),
        grid=(pl.cdiv(M, tm),),
        in_specs=[_row_spec(tm, D), _row_spec(tm, D),
                  _resident(wo.shape), _resident(bo.shape),
                  _resident(g.shape), _resident(beta.shape),
                  _resident(w1.shape), _resident(b1.shape),
                  _resident(w2.shape), _resident(b2.shape)],
        out_specs=_row_spec(tm, D),
        compiler_params=_compiler_params(),
        cost_estimate=cost,
    )(ctx, x, wo, bo, g, beta, w1, b1, w2, b2)


# ------------------------------- ViT forward ----------------------------------

def vit_forward(params, pixel_values):
    B, C, H, W = pixel_values.shape
    P = params["patch_size"]
    D = params["hidden"]
    nH = params["num_heads"]
    nph, npw = H // P, W // P
    num_patches = nph * npw

    # im2col: (B, C, H, W) -> (B*num_patches, C*P*P), channel-major per patch
    # (matches Conv2d weight layout (out, C, kh, kw) flattened; kernel==stride==P).
    patches = pixel_values.reshape(B, C, nph, P, npw, P)
    patches = patches.transpose(0, 2, 4, 1, 3, 5).reshape(B * num_patches, C * P * P)
    patches = patches.astype(jnp.bfloat16)

    x = matmul_bias(patches, params["patch_w"], params["patch_b"]).reshape(B, num_patches, D)
    cls = jnp.broadcast_to(params["cls_token"], (B, 1, D))
    x = jnp.concatenate([cls, x], axis=1) + params["pos_embed"]      # (B, S, D) f32
    S = num_patches + 1
    M = B * S

    x = x.reshape(M, D)                                               # f32 residual stream
    for layer in params["layers"]:
        # fused LN1 + Q/K/V projections -> packed (3, M, D) bf16 (no XLA head-split transpose)
        qkv = ln_qkv(x, layer["ln1_g"], layer["ln1_b"],
                     layer["wq"], layer["wk"], layer["wv"],
                     layer["bq"], layer["bk"], layer["bv"])
        # attention over (batch, head-group) grid; output is a lane-dense (B, S, D) slab
        ctx = attention(qkv.reshape(3, B, S, D), num_heads=nH)
        # fused o-proj + residual + LN2 + W1 + GELU + W2 + residual (one kernel per layer)
        x = oproj_ln_mlp(ctx.reshape(M, D), x, layer["wo"], layer["bo"],
                         layer["ln2_g"], layer["ln2_b"],
                         layer["w1"], layer["b1"], layer["w2"], layer["b2"])

    # Final LayerNorm is per-row -> only the B CLS rows feed the logits; LN just those
    # rows in plain XLA (deletes a full memory-bound pallas_call over all M tokens).
    cls_tok = x.reshape(B, S, D)[:, 0, :]
    mu = jnp.mean(cls_tok, axis=-1, keepdims=True)
    xc = cls_tok - mu
    var = jnp.mean(xc * xc, axis=-1, keepdims=True)
    cls_out = xc * jax.lax.rsqrt(var + LN_EPS) * params["ln_f_g"] + params["ln_f_b"]
    # Tiny classifier head (num_labels lanes) kept in plain XLA (lane width << 128).
    logits = cls_out @ params["w_cls"] + params["b_cls"]
    return logits


def quant_vit_forward(params, pixel_values, labels=None):
    """Mirrors QuantViT.forward: {'loss': ..., 'logits': ...}."""
    logits = vit_forward(params, pixel_values)
    loss = None
    if labels is not None:
        num_labels = params["num_labels"]
        # Tiny losses computed in plain XLA (negligible FLOPs, lane width = num_labels).
        if num_labels == 1:                                   # regression -> MSE
            loss = jnp.mean((jnp.squeeze(logits)
                             - jnp.squeeze(labels).astype(jnp.float32)) ** 2)
        elif jnp.issubdtype(labels.dtype, jnp.integer):       # single-label -> CrossEntropy
            logp = jax.nn.log_softmax(logits.astype(jnp.float32), axis=-1)
            nll = -jnp.take_along_axis(logp, labels.reshape(-1, 1).astype(jnp.int32),
                                       axis=-1)
            loss = jnp.mean(nll)
        else:                                                 # multi-label -> BCEWithLogits
            lab = labels.astype(jnp.float32)
            loss = jnp.mean(jnp.maximum(logits, 0.0) - logits * lab
                            + jnp.log1p(jnp.exp(-jnp.abs(logits))))
    return {"loss": loss, "logits": logits}


# ------------------------------ parameter init --------------------------------

def init_params(key, *, channels, image, patch, hidden, heads, layers,
                intermediate, num_labels):
    num_patches = (image // patch) ** 2
    seq = num_patches + 1
    q_scale = 1.0 / math.sqrt(hidden // heads)   # folded into Wq/bq (free at runtime)

    def nrm(k, shape, dtype=jnp.bfloat16, scale=0.02):
        return (scale * jax.random.normal(k, shape, dtype=jnp.float32)).astype(dtype)

    keys = iter(jax.random.split(key, 16 + 8 * layers))
    p = {
        "patch_size": patch,
        "hidden": hidden,
        "num_heads": heads,
        "num_labels": num_labels,
        "patch_w": nrm(next(keys), (channels * patch * patch, hidden)),   # bf16
        "patch_b": jnp.zeros((1, hidden), jnp.float32),
        "cls_token": nrm(next(keys), (1, 1, hidden), jnp.float32),
        "pos_embed": nrm(next(keys), (1, seq, hidden), jnp.float32),
        "ln_f_g": jnp.ones((1, hidden), jnp.float32),
        "ln_f_b": jnp.zeros((1, hidden), jnp.float32),
        "w_cls": nrm(next(keys), (hidden, num_labels), jnp.float32),
        "b_cls": jnp.zeros((1, num_labels), jnp.float32),
        "layers": [],
    }
    # TODO(synk): on v7x, store projection/MLP weights as fp8(e4m3) with per-channel
    # scales (bf16+fp8 MXU) once a validated quantization scheme exists; bf16 for now.
    for _ in range(layers):
        p["layers"].append({
            "ln1_g": jnp.ones((1, hidden), jnp.float32),
            "ln1_b": jnp.zeros((1, hidden), jnp.float32),
            # 1/sqrt(Dh) baked into the Q projection (a real checkpoint's q bias must
            # be scaled by q_scale too; it is zero here).
            "wq": nrm(next(keys), (hidden, hidden), scale=0.02 * q_scale),
            "wk": nrm(next(keys), (hidden, hidden)),
            "wv": nrm(next(keys), (hidden, hidden)),
            "bq": jnp.zeros((1, hidden), jnp.float32),
            "bk": jnp.zeros((1, hidden), jnp.float32),
            "bv": jnp.zeros((1, hidden), jnp.float32),
            "wo": nrm(next(keys), (hidden, hidden)),
            "bo": jnp.zeros((1, hidden), jnp.float32),
            "ln2_g": jnp.ones((1, hidden), jnp.float32),
            "ln2_b": jnp.zeros((1, hidden), jnp.float32),
            "w1": nrm(next(keys), (hidden, intermediate)),
            "b1": jnp.zeros((1, intermediate), jnp.float32),
            "w2": nrm(next(keys), (intermediate, hidden)),
            "b2": jnp.zeros((1, hidden), jnp.float32),
        })
    return p


# ----------------------------------- main --------------------------------------

if __name__ == "__main__":
    key = jax.random.PRNGKey(0)
    k_param, k_pix = jax.random.split(key)

    B, C, IMG, PATCH = 2, 3, 16, 8
    HIDDEN, HEADS, LAYERS, INTER, NUM_LABELS = 32, 2, 2, 64, 4

    params = init_params(k_param, channels=C, image=IMG, patch=PATCH,
                         hidden=HIDDEN, heads=HEADS, layers=LAYERS,
                         intermediate=INTER, num_labels=NUM_LABELS)

    pixel_values = jax.random.normal(k_pix, (B, C, IMG, IMG), dtype=jnp.float32)
    labels = jnp.array([1, 3], dtype=jnp.int32)

    out = quant_vit_forward(params, pixel_values, labels)
    jax.block_until_ready(out["logits"])
    jax.block_until_ready(out["loss"])

    assert out["logits"].shape == (B, NUM_LABELS)
    assert out["loss"].shape == ()
    print("KERNEL_OK")
</pallas_src>

<mosaic_0001>
module attributes {stable_mosaic.version = 11 : i64} {
  func.func @_probe_kernel(%arg0: i32, %arg1: memref<8x128xf32, #tpu.memory_space<vmem>>, %arg2: memref<8x128xf32, #tpu.memory_space<vmem>>, %arg3: memref<8x128xf32, #tpu.memory_space<vmem>>) attributes {dimension_semantics = [#tpu.dimension_semantics<arbitrary>], iteration_bounds = array<i64: 2>, scalar_prefetch = 0 : i64, scratch_operands = 0 : i64, tpu.core_type = #tpu.core_type<tc>, window_params = [{pipeline_mode = #tpu.pipeline_mode<synchronous>, transform_indices = @transform_0, window_bounds = array<i64: 8, 128>}, {pipeline_mode = #tpu.pipeline_mode<synchronous>, transform_indices = @transform_1, window_bounds = array<i64: 8, 128>}, {pipeline_mode = #tpu.pipeline_mode<synchronous>, transform_indices = @transform_2, window_bounds = array<i64: 8, 128>}]} {
    %c0 = arith.constant 0 : index
    %c0_0 = arith.constant 0 : index
    %0 = vector.load %arg1[%c0, %c0_0] : memref<8x128xf32, #tpu.memory_space<vmem>>, vector<8x128xf32>
    %c0_1 = arith.constant 0 : index
    %c0_2 = arith.constant 0 : index
    %1 = vector.load %arg2[%c0_1, %c0_2] : memref<8x128xf32, #tpu.memory_space<vmem>>, vector<8x128xf32>
    %2 = arith.addf %0, %1 : vector<8x128xf32>
    %c0_3 = arith.constant 0 : index
    %c0_4 = arith.constant 0 : index
    %3 = vector.load %arg3[%c0_3, %c0_4] : memref<8x128xf32, #tpu.memory_space<vmem>>, vector<8x128xf32>
    tpu.vector_store %arg3[%c0_3, %c0_4], %2 {strides = array<i32>} : memref<8x128xf32, #tpu.memory_space<vmem>>, vector<8x128xf32>,
    return
  }
  func.func @transform_0(%arg0: i32) -> (i32, i32) {
    %c0_i32 = arith.constant 0 : i32
    %c0_i32_0 = arith.constant 0 : i32
    %c0_i32_1 = arith.constant 0 : i32
    return %c0_i32, %c0_i32_0 : i32, i32
  }
  func.func @transform_1(%arg0: i32) -> (i32, i32) {
    %c0_i32 = arith.constant 0 : i32
    %c0_i32_0 = arith.constant 0 : i32
    %c0_i32_1 = arith.constant 0 : i32
    return %c0_i32, %c0_i32_0 : i32, i32
  }
  func.func @transform_2(%arg0: i32) -> (i32, i32) {
    %c0_i32 = arith.constant 0 : i32
    %c0_i32_0 = arith.constant 0 : i32
    %c0_i32_1 = arith.constant 0 : i32
    return %c0_i32, %c0_i32_0 : i32, i32
  }
}

module attributes {stable_mosaic.version = 11 : i64} {
  func.func @_matmul_bias_kernel(%arg0: i32, %arg1: memref<8x192xbf16, #tpu.memory_space<vmem>>, %arg2: memref<192x32xbf16, #tpu.memory_space<vmem>>, %arg3: memref<1x32xf32, #tpu.memory_space<vmem>>, %arg4: memref<8x32xf32, #tpu.memory_space<vmem>>) attributes {dimension_semantics = [#tpu.dimension_semantics<parallel>], iteration_bounds = array<i64: 1>, scalar_prefetch = 0 : i64, scratch_operands = 0 : i64, tpu.core_type = #tpu.core_type<tc>, window_params = [{transform_indices = @transform_0, window_bounds = array<i64: 8, 192>}, {pipeline_mode = #tpu.pipeline_mode<synchronous>, transform_indices = @transform_1, window_bounds = array<i64: 192, 32>}, {pipeline_mode = #tpu.pipeline_mode<synchronous>, transform_indices = @transform_2, window_bounds = array<i64: 1, 32>}, {transform_indices = @transform_3, window_bounds = array<i64: 8, 32>}]} {
    %c0 = arith.constant 0 : index
    %c0_0 = arith.constant 0 : index
    %0 = vector.load %arg1[%c0, %c0_0] : memref<8x192xbf16, #tpu.memory_space<vmem>>, vector<8x192xbf16>
    %c0_1 = arith.constant 0 : index
    %c0_2 = arith.constant 0 : index
    %1 = vector.load %arg2[%c0_1, %c0_2] : memref<192x32xbf16, #tpu.memory_space<vmem>>, vector<192x32xbf16>
    %cst = arith.constant dense<0.000000e+00> : vector<8x32xf32>
    %2 = tpu.matmul %0, %1, %cst {dimension_numbers = #tpu.dot_dimension_numbers<[1], [0], [0], [1], [0, 0, 1, 1], [], []>} : vector<8x192xbf16>, vector<192x32xbf16>, vector<8x32xf32> -> vector<8x32xf32>
    %c0_3 = arith.constant 0 : index
    %c0_4 = arith.constant 0 : index
    %3 = vector.load %arg3[%c0_3, %c0_4] : memref<1x32xf32, #tpu.memory_space<vmem>>, vector<1x32xf32>
    %4 = vector.broadcast %3 : vector<1x32xf32> to vector<8x32xf32>
    %5 = arith.addf %2, %4 : vector<8x32xf32>
    %c0_5 = arith.constant 0 : index
    %c0_6 = arith.constant 0 : index
    %6 = vector.load %arg4[%c0_5, %c0_6] : memref<8x32xf32, #tpu.memory_space<vmem>>, vector<8x32xf32>
    tpu.vector_store %arg4[%c0_5, %c0_6], %5 {strides = array<i32>} : memref<8x32xf32, #tpu.memory_space<vmem>>, vector<8x32xf32>,
    return
  }
  func.func @transform_0(%arg0: i32) -> (i32, i32) {
    %c0_i32 = arith.constant 0 : i32
    %c0_i32_0 = arith.constant 0 : i32
    return %arg0, %c0_i32 : i32, i32
  }
  func.func @transform_1(%arg0: i32) -> (i32, i32) {
    %c0_i32 = arith.constant 0 : i32
    %c0_i32_0 = arith.constant 0 : i32
    %c0_i32_1 = arith.constant 0 : i32
    return %c0_i32, %c0_i32_0 : i32, i32
  }
  func.func @transform_2(%arg0: i32) -> (i32, i32) {
    %c0_i32 = arith.constant 0 : i32
    %c0_i32_0 = arith.constant 0 : i32
    %c0_i32_1 = arith.constant 0 : i32
    return %c0_i32, %c0_i32_0 : i32, i32
  }
  func.func @transform_3(%arg0: i32) -> (i32, i32) {
    %c0_i32 = arith.constant 0 : i32
    %c0_i32_0 = arith.constant 0 : i32
    return %arg0, %c0_i32 : i32, i32
  }
}

</mosaic_0001>

<bundles_post_ra>
// kernel: tpu_custom_call.1
= control target key start
LH: loop header
LB: loop body
LE: loop exit
PB: predicated region body
PF: predicated region fallthrough
CT: control target
= control target key end

     0   :  { %7 = vsyncpa [#allocation3], 0  ;;  %s431_s0 = inlined_call_operand.hbm [shape: f32[8,128], index: 0, kind: input, shape index: {}]   ;;  %s432_s1 = inlined_call_operand.hbm [shape: f32[8,128], index: 1, kind: input, shape index: {}]   ;;  %s433_s2 = inlined_call_operand.hbm [shape: f32[8,128], index: 2, kind: output, shape index: {}]  }
   0x1   :  { %8 = vsyncpa [#allocation6], 0 }
   0x2   :  { %9 = vsyncpa [#allocation4], 0  ;;  %s357_s9 = smov 0  }
   0x3 LB: > { %s196_s10 = sadd.s32 4294967295, %s337_s9   ;;  %p197_p0 = scmp.ge.s32.totalorder %s337_s9, 1  ;;  %s337_s9 = sphi %s357_s9, %s15_s9  }
   0x4   : > { %p83_p1 = scmp.lt.s32.totalorder %s337_s9, 3  ;;  %p367_p2 = scmp.eq.s32.totalorder %s196_s10, 0 }
   0x5   : > { %s339_s13 = smov [#allocation2]   ;;  %s340_s15 = smov [#allocation5]  }
   0x6   : > { %s437_s11 = scalar_select %p367_p2, 1, 0 }
   0x7   : > { %p371_p3 = pnand %p197_p0, %p83_p1  ;;  %s96_s14 = sshll.u32 %s339_s13, 4  ;;  %s97_s14 = int_to_ptr.vmem [resolvable:$true] %s96_s14 }
   0x8   : > { %s107_s16 = sshll.u32 %s340_s15, 4  ;;  %s254_s18 = scalar_lea.vmem %s97_s14, 128  ;;  %s108_s16 = int_to_ptr.vmem [resolvable:$true] %s107_s16 }
   0x9   : > { %s438_s12 = scalar_select %p371_p3, 1, 0 }
   0xa   : > { %p219_p4 = pneg %p371_p3  ;;  %p255_p7 = scmp.ne.s32.totalorder %s97_s14, %s254_s18 }
   0xb   : > { %p262_p10 = scmp.lt.s32.totalorder %s97_s14, %s97_s14  ;;  %p263_p11 = scmp.lt.s32.totalorder %s254_s18, %s254_s18 }
   0xc   : > { %p379_p5 = pnand %p367_p2, %p219_p4 }
   0xd   : > { %p264_p12 = por %p263_p11, %p262_p10 }
   0xe   : > { %p245_p6 = pneg %p379_p5 }
  0x10   : > { %p257_p8 = pnand %p255_p7, %p245_p6 }
  0x12   : > { %p258_p9 = pneg %p257_p8 }
  0x14   : > { %p265_p13 = pnand %p264_p12, %p258_p9 }
  0x16   : > { %268 = shalt.err (!%p265_p13)
}
  0x17   : > { %222 = dma.hbm_to_vmem [thread:$0]  (!%p379_p5), %s431_s0, 128, %s97_s14, [#allocation3]  }
  0x18   : > { %s280_s21 = scalar_lea.vmem %s108_s16, 128  ;;  %p288_p7 = scmp.lt.s32.totalorder %s108_s16, %s108_s16 }
  0x19   : > { %p281_p0 = scmp.ne.s32.totalorder %s108_s16, %s280_s21  ;;  %p289_p8 = scmp.lt.s32.totalorder %s280_s21, %s280_s21 }
  0x1b   : > { %p283_p1 = pnand %p281_p0, %p245_p6  ;;  %p290_p2 = por %p289_p8, %p288_p7 }
  0x1d   : > { %p284_p4 = pneg %p283_p1 }
  0x1f   : > { %p291_p3 = pnand %p290_p2, %p284_p4 }
  0x21   : > { %294 = shalt.err (!%p291_p3)
}
  0x22   : > { %225 = dma.hbm_to_vmem [thread:$0]  (!%p379_p5), %s432_s1, 128, %s108_s16, [#allocation6]  }
  0x23   : > { %p440_p9 = scmp.ne.s32.totalorder %s438_s12, 0 }
  0x24   : > { %p441_p10 = scmp.ne.s32.totalorder (!%p440_p9), %s437_s11, 0 }
  0x25   : > { %120 = sbr.rel (%p440_p9) target bundleno = 60 (0x3c), region = 28 }
  0x2a   : > { %324 = dma.done.wait (%p441_p10), [#allocation3], 128  }
  0x2b   : > { %326 = vsyncadd (%p441_p10), [#allocation3], 4294967168 }
  0x2c   : > { %328 = dma.done.wait (%p441_p10), [#allocation6], 128  }
  0x2d   : > { %330 = vsyncadd (%p441_p10), [#allocation6], 4294967168  ;;  %s341_s24 = smov [#allocation7]   ;;  %v136_v0 = vld [vmem:[#allocation2] sm:$0xff]  ;;  %v137_v1 = vld [vmem:[#allocation5] sm:$0xff]  ;;  %p413_p2 = scmp.eq.s32.totalorder %s196_s10, 1 }
  0x2e   : > { %s147_s25 = sshll.u32 %s341_s24, 4  ;;  %v138_v2 = vadd.f32 %v137_v1, %v136_v0  ;;  %s148_s25 = int_to_ptr.vmem [resolvable:$true] %s147_s25 }
  0x2f   : > { %s295_s27 = scalar_lea.vmem %s148_s25, 128  ;;  %p302_p11 = scmp.lt.s32.totalorder %s148_s25, %s148_s25 }
  0x30   : > { %139 = vst [vmem:[#allocation7] sm:$0xff] %v138_v2  ;;  %p296_p3 = scmp.ne.s32.totalorder %s148_s25, %s295_s27  ;;  %p303_p12 = scmp.lt.s32.totalorder %s295_s27, %s295_s27 }
  0x32   : > { %p297_p5 = pnand %p296_p3, %p413_p2  ;;  %p304_p13 = por %p303_p12, %p302_p11 }
  0x34   : > { %p298_p6 = pneg %p297_p5 }
  0x36   : > { %p305_p0 = pnand %p304_p13, %p298_p6 }
  0x38   : > { %308 = shalt.err (!%p305_p0)
}
  0x39   : > { %216 = dma.vmem_to_hbm [thread:$0]  (%p413_p2), %s148_s25, 128, %s433_s2, [#allocation4]  }
  0x3a   : > { %332 = dma.done.wait (%p413_p2), [#allocation4], 128  }
  0x3b   : > { %334 = vsyncadd (%p413_p2), [#allocation4], 4294967168 }
  0x3c PF: > { %s15_s9 = sadd.s32 1, %s337_s9  }
  0x3d   : > { %p12_p1 = scmp.ge.s32.totalorder %s15_s9, 4  }
  0x3f   :  { %14 = sbr.rel (!%p12_p1) target bundleno = 3 (0x3), region = 61 }
  0x44   :  { %160 = vsyncpa [#allocation3], 1 }
  0x45   :  { %162 = vsyncpa [#allocation3 + $0x1], 1 }
  0x46   :  { %163 = vsyncpa [#allocation6], 1 }
  0x47   :  { %164 = vsyncpa [#allocation4], 1 }
  0x48   :  { %166 = vsyncpa [#allocation4 + $0x1], 1 }

// kernel: tpu_custom_call.1
= control target key start
LH: loop header
LB: loop body
LE: loop exit
PB: predicated region body
PF: predicated region fallthrough
CT: control target
= control target key end

     0   :  { %v240_v1 = vmov 0   ;;  %vm126_vm0 = vcmask 523264   ;;  %s307_s0 = inlined_call_operand.vmem [shape: bf16[8,192], index: 0, kind: input, shape index: {}]   ;;  %s308_s1 = inlined_call_operand.vmem [shape: bf16[192,32], index: 1, kind: input, shape index: {}]   ;;  %s309_s2 = inlined_call_operand.vmem [shape: f32[1,32], index: 2, kind: input, shape index: {}]   ;;  %s310_s3 = inlined_call_operand.hbm [shape: f32[8,32], index: 3, kind: output, shape index: {}]  }
   0x1   :  { %v204_v0 = vld [vmem:[%s308_s1 + $0x38] sm:$0xff]   ;;  %130 = vmatprep.subr.bf16.mxu0 %v240_v1  ;;  %v205_v2 = vld [vmem:[%s308_s1 + $0x30] sm:$0xff]   ;;  %v206_v3 = vld [vmem:[%s308_s1 + $0x28] sm:$0xff]  }
   0x2   :  { %131 = vmatpush1.bf16.msra.mxu0 %v204_v0  ;;  %v207_v4 = vld [vmem:[%s308_s1 + $0x20] sm:$0xff]  }
   0x3   :  { %132 = vmatprep.subr.bf16.mxu0 %v240_v1  ;;  %v16_v5 = vld [vmem:[%s307_s0] sm:$0xff] }
   0x6   :  { %133 = vmatpush1.bf16.msra.mxu0 %v205_v2 }
   0x7   :  { %134 = vmatprep.subr.bf16.mxu0 %v240_v1 }
   0xa   :  { %135 = vmatpush1.bf16.msra.mxu0 %v206_v3 }
   0xb   :  { %136 = vmatprep.subr.bf16.mxu0 %v240_v1 }
   0xc   :  { %8 = vsyncpa [#allocation3], 0  ;;  %v188_v6 = vcombine.high %v16_v5, %v16_v5  ;;  %v208_v7 = vld [vmem:[%s308_s1 + $0x18] sm:$0xff]   ;;  %v209_v8 = vld [vmem:[%s308_s1 + $0x10] sm:$0xff]   ;;  %v187_v15 = vcombine.low %v16_v5, %v16_v5  ;;  %s241_s12 = smov [#allocation2]   ;;  %vm170_vm1 = vcmask 261120  }
   0xd   :  { %v210_v9 = vld [vmem:[%s308_s1 + $0x8] sm:$0xff]   ;;  %v211_v10 = vld [vmem:[%s308_s1] sm:$0xff]   ;;  %v212_v11 = vld [vmem:[%s308_s1 + $0x58] sm:$0xff]   ;;  %s178_s13 = sshll.u32 %s241_s12, 4  ;;  %s179_s13 = int_to_ptr.vmem [resolvable:$true] %s178_s13 }
   0xe   :  { %137 = vmatpush1.bf16.msra.mxu0 %v207_v4  ;;  %201 = vmatprep.mubr.msk.bf16.mxu0 %vm126_vm0, %v188_v6  ;;  %v213_v12 = vld [vmem:[%s308_s1 + $0x50] sm:$0xff]   ;;  %v214_v13 = vld [vmem:[%s308_s1 + $0x48] sm:$0xff]   ;;  %v215_v14 = vld [vmem:[%s308_s1 + $0x40] sm:$0xff]   ;;  %s218_s14 = scalar_lea.vmem %s179_s13, 128  ;;  %p223_p1 = scmp.lt.s32.totalorder %s179_s13, %s179_s13 }
   0xf   :  { %138 = vmatprep.subr.bf16.mxu0 %v240_v1  ;;  %v186_v16 = vld [vmem:[%s309_s2] ss:$0 sm:$0xff]  ;;  %p219_p0 = scmp.ne.s32.totalorder %s179_s13, %s218_s14  ;;  %p224_p2 = scmp.lt.s32.totalorder %s218_s14, %s218_s14 }
  0x11   :  { %p225_p3 = por %p224_p2, %p223_p1 }
  0x12   :  { %139 = vmatpush1.bf16.msra.mxu0 %v208_v7 }
  0x13   :  { %140 = vmatprep.subr.bf16.mxu0 %v240_v1  ;;  %p226_p4 = pnand %p225_p3, %p219_p0 }
  0x16   :  { %141 = vmatpush1.bf16.msra.mxu0 %v209_v8 }
  0x17   :  { %142 = vmatprep.subr.bf16.mxu0 %v240_v1 }
  0x1a   :  { %143 = vmatpush1.bf16.msra.mxu0 %v210_v9 }
  0x1b   :  { %144 = vmatprep.subr.bf16.mxu0 %v240_v1 }
  0x1e   :  { %145 = vmatpush1.bf16.msra.mxu0 %v211_v10 }
  0x1f   :  { %154 = vmatprep.subr.bf16.mxu0 %v240_v1 }
  0x22   :  { %155 = vmatpush2.bf16.msra.mxu0 %v212_v11 }
  0x23   :  { %156 = vmatprep.subr.bf16.mxu0 %v240_v1 }
  0x26   :  { %157 = vmatpush2.bf16.msra.mxu0 %v213_v12 }
  0x27   :  { %158 = vmatprep.subr.bf16.mxu0 %v240_v1 }
  0x2a   :  { %159 = vmatpush2.bf16.msra.mxu0 %v214_v13 }
  0x2b   :  { %160 = vmatprep.subr.bf16.mxu0 %v240_v1 }
  0x2e   :  { %161 = vmatpush2.bf16.msra.mxu0 %v215_v14 }
  0x31   :  { %163 = vmatmul.mubr.bf16.vlgmr.msra.gmra.mxu0 %v187_v15 }
  0xf1   :  { %v164_v17 = vpop.f32.mrf.mxu0 }
  0xf2   :  { %v165_v18 = vadd.f32 %v186_v16, %v164_v17 }
  0xf3   :  { %v166_v19 = vpop.f32.mrf.mxu0 }
  0xf4   :  { %171 = vst.msk [vmem:[#allocation2] sm:$0xff] %vm170_vm1, %v165_v18 }
  0xf5   :  { %v167_v20 = vpop.f32.mrf.mxu0 }
  0xf6   :  { %229 = shalt.err (!%p226_p4)
}
  0xf7   :  { %181 = dma.vmem_to_hbm [thread:$0]  %s179_s13, 128, %s310_s3, [#allocation3]   ;;  %v168_v21 = vpop.f32.mrf.mxu0 }
  0xf8   :  { %238 = dma.done.wait [#allocation3], 128  }
  0xf9   :  { %239 = vsyncadd [#allocation3], 4294967168 }
  0xfa   :  { %185 = vsyncpa [#allocation3], 1 }

</bundles_post_ra>
